<compile_context>
chip_gen: v7x
topology: tpu7x:2x2x1
jax: 0.10.0
libtpu: 0.0.40
codegen_flags: <defaults>
</compile_context>

<pallas_src>
from functools import partial
from typing import NamedTuple

import jax
import jax.numpy as jnp
from jax.experimental import pallas as pl
from jax.experimental.pallas import tpu as pltpu


_LANE = 128
_VMEM_LIMIT = 48 * 1024 * 1024   # explicit scoped-VMEM cap, headroom under v7x's 64 MiB/TC


def _round_up(x, m):
    return ((x + m - 1) // m) * m


# ---------------------------------------------------------------------------
# Per-graph preparation (hoisted across layers)
# ---------------------------------------------------------------------------
class PreparedGraph(NamedTuple):
    a_i8: jax.Array   # (N_pad, N_pad) int8 adjacency, zero padded
    d: jax.Array      # (N_pad, 1) f32, 1/sqrt(1 + deg)  (self-loop folded in)
    n: int            # original node count


def prepare_graph(A) -> PreparedGraph:
    """Pad + quantize the adjacency and compute d = rsqrt(rowsum(A)+1) once.

    Shared by every GraphConv layer on the same graph, so no kernel re-streams
    the N^2 adjacency just for a rowsum and A is quantized/padded only once.
    """
    n = A.shape[0]
    n_pad = max(_LANE, _round_up(n, _LANE))
    deg = jnp.sum(A.astype(jnp.float32), axis=1, keepdims=True) + 1.0
    d = jax.lax.rsqrt(deg)
    d = jnp.pad(d, ((0, n_pad - n), (0, 0)), constant_values=1.0)
    a_i8 = jnp.pad(jnp.rint(A.astype(jnp.float32)).astype(jnp.int8),
                   ((0, n_pad - n), (0, n_pad - n)))
    return PreparedGraph(a_i8=a_i8, d=d, n=n)


def _pick_tiles(n_pad, out_pad):
    """Row tile tm (MXU M dim, multiple of 32 for int8 A) and contraction tile
    tk, sized so the double-buffered A(int8) + P(bf16) streams stay well inside
    the scoped VMEM budget."""
    tm = 256 if n_pad % 256 == 0 else 128
    budget = 12 * 1024 * 1024
    tk = 128
    for cand in (2048, 1024, 512, 256, 128):
        if n_pad % cand:
            continue
        need = 2 * tm * cand + 2 * cand * out_pad * 2   # A dbuf + P dbuf bytes
        if need <= budget:
            tk = cand
            break
    return tm, tk


# ---------------------------------------------------------------------------
# Kernels
# ---------------------------------------------------------------------------
def _proj_kernel(d_ref, h_ref, w_ref, p_ref):
    """Per row tile: P = D^-1/2 @ (H @ W), stored lane-dense in bf16."""
    hw = jnp.dot(h_ref[...], w_ref[...], preferred_element_type=jnp.float32)
    p_ref[...] = (d_ref[...] * hw).astype(p_ref.dtype)


def _activate(z, activation, out_features):
    if activation == "relu":
        return jnp.maximum(z, 0.0)
    # softmax over the feature axis, ignoring the zero-padded lanes
    lane = jax.lax.broadcasted_iota(jnp.int32, z.shape, 1)
    z = jnp.where(lane < out_features, z, -jnp.inf)
    z = z - jnp.max(z, axis=1, keepdims=True)
    e = jnp.exp(z)
    return e / jnp.sum(e, axis=1, keepdims=True)      # exact normalization


def _agg_kernel(a_ref, d_ref, p_ref, prow_ref, o_ref, acc_ref, *,
                activation, out_features):
    """Row tile i, contraction tile k:
         acc  = P_rows_i              at k == 0   (analytic +I self-loop)
         acc += A[i,k] @ P[k]         every k     (int8 -> bf16 cast, f32 acc)
         out  = act(d_i * acc)        at k == last
    """
    k = pl.program_id(1)

    @pl.when(k == 0)
    def _():
        acc_ref[...] = prow_ref[...].astype(jnp.float32)

    acc_ref[...] += jnp.dot(a_ref[...].astype(jnp.bfloat16), p_ref[...],
                            preferred_element_type=jnp.float32)

    @pl.when(k == pl.num_programs(1) - 1)
    def _():
        z = d_ref[...] * acc_ref[...]
        o_ref[...] = _activate(z, activation, out_features).astype(o_ref.dtype)


def _agg_skip_kernel(a_ref, d_ref, p_ref, prow_ref, hs_ref, ws_ref, o_ref,
                     acc_ref, *, activation, out_features):
    """Same as _agg_kernel plus the fused skip projection Hs_rows @ Ws added at
    the finalize step (no (N, out_pad) skip tensor ever hits HBM)."""
    k = pl.program_id(1)

    @pl.when(k == 0)
    def _():
        acc_ref[...] = prow_ref[...].astype(jnp.float32)

    acc_ref[...] += jnp.dot(a_ref[...].astype(jnp.bfloat16), p_ref[...],
                            preferred_element_type=jnp.float32)

    @pl.when(k == pl.num_programs(1) - 1)
    def _():
        z = d_ref[...] * acc_ref[...]
        z = z + jnp.dot(hs_ref[...], ws_ref[...],
                        preferred_element_type=jnp.float32)
        o_ref[...] = _activate(z, activation, out_features).astype(o_ref.dtype)


# ---------------------------------------------------------------------------
# Wrapper
# ---------------------------------------------------------------------------
def graph_conv(graph, H_in, W, activation="relu", H_skip_in=None, W_skip=None):
    """Pallas TPU GraphConv forward:
         act(D^-1/2 (A+I) D^-1/2 @ H_in @ W [+ H_skip_in @ W_skip])

    `graph` is either the raw (N, N) adjacency or a PreparedGraph (preferred:
    prepare once and share the padded int8 A and hoisted degrees across layers).
    """
    if activation not in ("relu", "softmax"):
        raise ValueError("activations supported are 'relu' and 'softmax'")
    has_skip = H_skip_in is not None
    if has_skip and W_skip is None:
        raise ValueError("pass W_skip together with H_skip_in")
    if not isinstance(graph, PreparedGraph):
        graph = prepare_graph(graph)

    a_i8, d, n = graph
    n_pad = a_i8.shape[0]
    in_f = H_in.shape[1]
    out_f = W.shape[1]
    out_pad = _round_up(out_f, _LANE)                  # lane-dense output width
    tm, tk = _pick_tiles(n_pad, out_pad)

    # bf16 MXU operands are shipped from HBM in bf16 (half the read bytes).
    H = jnp.pad(H_in.astype(jnp.bfloat16), ((0, n_pad - n), (0, 0)))
    Wp = jnp.pad(W.astype(jnp.float32),
                 ((0, 0), (0, out_pad - out_f))).astype(jnp.bfloat16)

    # relu hidden layers come back in bf16 (halves writeback + next-layer read);
    # only the final softmax layer is emitted in f32.
    out_dtype = jnp.float32 if activation == "softmax" else jnp.bfloat16

    # ---- pass 1 (row tiled): P = D^-1/2 (H @ W) ------------------------------
    P = pl.pallas_call(
        _proj_kernel,
        out_shape=jax.ShapeDtypeStruct((n_pad, out_pad), jnp.bfloat16),
        grid=(n_pad // tm,),
        in_specs=[
            pl.BlockSpec((tm, 1), lambda i: (i, 0)),             # d rows
            pl.BlockSpec((tm, in_f), lambda i: (i, 0)),          # H rows
            pl.BlockSpec((in_f, out_pad), lambda i: (0, 0)),     # W (whole)
        ],
        out_specs=pl.BlockSpec((tm, out_pad), lambda i: (i, 0)),
        compiler_params=pltpu.CompilerParams(
            dimension_semantics=("parallel",),
            vmem_limit_bytes=_VMEM_LIMIT),
    )(d, H, Wp)

    # ---- pass 2 (rows x contraction): out = act(d * (A @ P + P_rows)) -------
    agg_in_specs = [
        pl.BlockSpec((tm, tk), lambda i, k: (i, k)),             # A tile (int8)
        pl.BlockSpec((tm, 1), lambda i, k: (i, 0)),              # d rows
        pl.BlockSpec((tk, out_pad), lambda i, k: (k, 0)),        # P contraction tile
        pl.BlockSpec((tm, out_pad), lambda i, k: (i, 0)),        # P rows (self-loop)
    ]
    agg_args = [a_i8, d, P, P]
    if has_skip:
        skip_in = H_skip_in.shape[1]
        Hs = jnp.pad(H_skip_in.astype(jnp.bfloat16), ((0, n_pad - n), (0, 0)))
        Wsp = jnp.pad(W_skip.astype(jnp.float32),
                      ((0, 0), (0, out_pad - out_f))).astype(jnp.bfloat16)
        agg_in_specs += [
            pl.BlockSpec((tm, skip_in), lambda i, k: (i, 0)),        # H_skip rows
            pl.BlockSpec((skip_in, out_pad), lambda i, k: (0, 0)),   # W_skip (whole)
        ]
        agg_args += [Hs, Wsp]
        agg = partial(_agg_skip_kernel, activation=activation, out_features=out_f)
    else:
        agg = partial(_agg_kernel, activation=activation, out_features=out_f)

    out = pl.pallas_call(
        agg,
        out_shape=jax.ShapeDtypeStruct((n_pad, out_pad), out_dtype),
        grid=(n_pad // tm, n_pad // tk),
        in_specs=agg_in_specs,
        out_specs=pl.BlockSpec((tm, out_pad), lambda i, k: (i, 0)),
        scratch_shapes=[pltpu.VMEM((tm, out_pad), jnp.float32)],
        compiler_params=pltpu.CompilerParams(
            dimension_semantics=("parallel", "arbitrary"),
            vmem_limit_bytes=_VMEM_LIMIT),
    )(*agg_args)
    return out[:n, :out_f]


# ---------------------------------------------------------------------------
# Pure-JAX reference (mirrors the torch forward) and demo
# ---------------------------------------------------------------------------
def _reference(A, H, W, activation, H_skip=None, W_skip=None):
    N = A.shape[0]
    A_ = A + jnp.eye(N, dtype=A.dtype)
    d = 1.0 / jnp.sqrt(jnp.sum(A_, axis=1))
    A_norm = A_ * d[:, None] * d[None, :]
    out = A_norm @ H.astype(jnp.float32) @ W
    if H_skip is not None:
        out = out + H_skip.astype(jnp.float32) @ W_skip
    if activation == "relu":
        return jnp.maximum(out, 0.0)
    z = out - jnp.max(out, axis=1, keepdims=True)
    e = jnp.exp(z)
    return e / jnp.sum(e, axis=1, keepdims=True)


def xavier_uniform(key, fan_in, fan_out, dtype=jnp.float32):
    bound = (6.0 / (fan_in + fan_out)) ** 0.5
    return jax.random.uniform(key, (fan_in, fan_out),
                              minval=-bound, maxval=bound, dtype=dtype)


if __name__ == "__main__":
    key = jax.random.PRNGKey(0)
    N, in_features, hidden_features, out_features = 16, 8, 32, 4
    k_adj, k_x, k_w1, k_w2, k_ws = jax.random.split(key, 5)

    # Symmetric binary adjacency with no self-loops.
    upper = (jax.random.uniform(k_adj, (N, N)) < 0.3).astype(jnp.float32)
    A = jnp.triu(upper, 1)
    A = A + A.T

    X = jax.random.normal(k_x, (N, in_features), dtype=jnp.float32)
    W1 = xavier_uniform(k_w1, in_features, hidden_features)
    W2 = xavier_uniform(k_w2, hidden_features, out_features)
    W_skip = xavier_uniform(k_ws, in_features, hidden_features)

    # Prepare once per graph; padded int8 A + hoisted degrees shared by layers.
    graph = prepare_graph(A)

    # GraphConv(relu) -> GraphConv(softmax): the standard 2-layer stacking.
    h1 = graph_conv(graph, X, W1, activation="relu")
    out = graph_conv(graph, h1, W2, activation="softmax")
    # GraphConv(relu) with a skip connection (fused skip projection).
    h_skip = graph_conv(graph, X, W1, activation="relu",
                        H_skip_in=X, W_skip=W_skip)
    jax.block_until_ready((h1, out, h_skip))

    assert h1.shape == (N, hidden_features)
    assert out.shape == (N, out_features)
    assert h_skip.shape == (N, hidden_features)

    # bf16-operand / f32-accumulate kernels vs f32 reference.
    assert jnp.allclose(h1.astype(jnp.float32),
                        _reference(A, X, W1, "relu"), atol=6e-2, rtol=6e-2)
    assert jnp.allclose(out,
                        _reference(A, h1, W2, "softmax"), atol=6e-2, rtol=6e-2)
    assert jnp.allclose(h_skip.astype(jnp.float32),
                        _reference(A, X, W1, "relu", X, W_skip),
                        atol=6e-2, rtol=6e-2)

    print("KERNEL_OK")
</pallas_src>

<mosaic_0001>
module attributes {stable_mosaic.version = 11 : i64} {
  func.func @_proj_kernel(%arg0: i32, %arg1: memref<128x1xf32, #tpu.memory_space<vmem>>, %arg2: memref<128x8xbf16, #tpu.memory_space<vmem>>, %arg3: memref<8x128xbf16, #tpu.memory_space<vmem>>, %arg4: memref<128x128xbf16, #tpu.memory_space<vmem>>) attributes {dimension_semantics = [#tpu.dimension_semantics<parallel>], iteration_bounds = array<i64: 1>, scalar_prefetch = 0 : i64, scratch_operands = 0 : i64, tpu.core_type = #tpu.core_type<tc>, window_params = [{transform_indices = @transform_0, window_bounds = array<i64: 128, 1>}, {transform_indices = @transform_1, window_bounds = array<i64: 128, 8>}, {pipeline_mode = #tpu.pipeline_mode<synchronous>, transform_indices = @transform_2, window_bounds = array<i64: 8, 128>}, {transform_indices = @transform_3, window_bounds = array<i64: 128, 128>}]} {
    %c0 = arith.constant 0 : index
    %c0_0 = arith.constant 0 : index
    %0 = vector.load %arg2[%c0, %c0_0] : memref<128x8xbf16, #tpu.memory_space<vmem>>, vector<128x8xbf16>
    %c0_1 = arith.constant 0 : index
    %c0_2 = arith.constant 0 : index
    %1 = vector.load %arg3[%c0_1, %c0_2] : memref<8x128xbf16, #tpu.memory_space<vmem>>, vector<8x128xbf16>
    %cst = arith.constant dense<0.000000e+00> : vector<128x128xf32>
    %2 = tpu.matmul %0, %1, %cst {dimension_numbers = #tpu.dot_dimension_numbers<[1], [0], [0], [1], [0, 0, 1, 1], [], []>} : vector<128x8xbf16>, vector<8x128xbf16>, vector<128x128xf32> -> vector<128x128xf32>
    %c0_3 = arith.constant 0 : index
    %c0_4 = arith.constant 0 : index
    %3 = vector.load %arg1[%c0_3, %c0_4] : memref<128x1xf32, #tpu.memory_space<vmem>>, vector<128x1xf32>
    %4 = vector.broadcast %3 : vector<128x1xf32> to vector<128x128xf32>
    %5 = arith.mulf %4, %2 : vector<128x128xf32>
    %6 = arith.truncf %5 : vector<128x128xf32> to vector<128x128xbf16>
    %c0_5 = arith.constant 0 : index
    %c0_6 = arith.constant 0 : index
    %7 = vector.load %arg4[%c0_5, %c0_6] : memref<128x128xbf16, #tpu.memory_space<vmem>>, vector<128x128xbf16>
    tpu.vector_store %arg4[%c0_5, %c0_6], %6 {strides = array<i32>} : memref<128x128xbf16, #tpu.memory_space<vmem>>, vector<128x128xbf16>,
    return
  }
  func.func @transform_0(%arg0: i32) -> (i32, i32) {
    %c0_i32 = arith.constant 0 : i32
    %c0_i32_0 = arith.constant 0 : i32
    return %arg0, %c0_i32 : i32, i32
  }
  func.func @transform_1(%arg0: i32) -> (i32, i32) {
    %c0_i32 = arith.constant 0 : i32
    %c0_i32_0 = arith.constant 0 : i32
    return %arg0, %c0_i32 : i32, i32
  }
  func.func @transform_2(%arg0: i32) -> (i32, i32) {
    %c0_i32 = arith.constant 0 : i32
    %c0_i32_0 = arith.constant 0 : i32
    %c0_i32_1 = arith.constant 0 : i32
    return %c0_i32, %c0_i32_0 : i32, i32
  }
  func.func @transform_3(%arg0: i32) -> (i32, i32) {
    %c0_i32 = arith.constant 0 : i32
    %c0_i32_0 = arith.constant 0 : i32
    return %arg0, %c0_i32 : i32, i32
  }
}

</mosaic_0001>

<bundles_post_ra>
// kernel: tpu_custom_call.1
= control target key start
LH: loop header
LB: loop body
LE: loop exit
PB: predicated region body
PF: predicated region fallthrough
CT: control target
= control target key end

     0   :  { %vm98_vm0 = vcmask 1043456   ;;  %vm73_vm1 = vcmask 64512   ;;  %v571_v5 = vmov 0   ;;  %s690_s0 = inlined_call_operand.vmem [shape: f32[128,1], index: 0, kind: input, shape index: {}]   ;;  %s691_s1 = inlined_call_operand.vmem [shape: bf16[128,8], index: 1, kind: input, shape index: {}]   ;;  %s692_s2 = inlined_call_operand.vmem [shape: bf16[8,128], index: 2, kind: input, shape index: {}]   ;;  %s693_s3 = inlined_call_operand.hbm [shape: bf16[128,128], index: 3, kind: output, shape index: {}]  }
   0x1   :  { %v32_v0 = vld [vmem:[%s692_s2] sm:$0xf]  ;;  %v541_v4 = vld [vmem:[%s691_s1 + $0x8] sm:$0xff]   ;;  %538 = vset.pattern.permute.xlu1 %v571_v5  ;;  %537 = vset.pattern.permute.xlu0 %v571_v5  ;;  %v543_v7 = vld [vmem:[%s691_s1 + $0x10] sm:$0xff]  }
   0x2   :  { %v539_v1 = vld [vmem:[%s691_s1] sm:$0xff]   ;;  %531 = vmatprep.subr.msk.bf16.mxu0 %vm98_vm0, %v32_v0  ;;  %532 = vmatprep.subr.msk.bf16.mxu1 %vm98_vm0, %v32_v0  ;;  %v100_v2 = vsel %vm98_vm0, %v32_v0, 0  ;;  %v542_v6 = vld [vmem:[%s691_s1 + $0x28] sm:$0xff]   ;;  %v544_v8 = vld [vmem:[%s691_s1 + $0x30] sm:$0xff]  }
   0x3   :  { %512 = vmatpush3.bf16.msra.mxu0 %v100_v2  ;;  %530 = vmatpush3.bf16.msra.mxu1 %v100_v2  ;;  %v540_v3 = vld [vmem:[%s691_s1 + $0x20] sm:$0xff]   ;;  %v201_v9 = vld [vmem:[%s690_s0 + $0x10] sm:$0xff]  ;;  %v545_v10 = vld [vmem:[%s691_s1 + $0x18] sm:$0xff]  }
   0x4   :  { %513 = vmatprep.mubr.msk.bf16.mxu0 %vm73_vm1, %v539_v1  ;;  %521 = vmatprep.mubr.msk.bf16.mxu1 %vm73_vm1, %v540_v3  ;;  %v199_v11 = vld [vmem:[%s690_s0] sm:$0xff]  ;;  %v546_v12 = vld [vmem:[%s691_s1 + $0x38] sm:$0xff]   ;;  %v200_v14 = vld [vmem:[%s690_s0 + $0x8] sm:$0xff] }
   0x5   :  { %227 = vperm.xlu1 %538, %v201_v9   ;;  %217 = vperm.xlu0 %537, %v199_v11   ;;  %v202_v13 = vld [vmem:[%s690_s0 + $0x18] sm:$0xff]  ;;  %v204_v15 = vld [vmem:[%s690_s0 + $0x28] sm:$0xff] }
   0x6   :  { %514 = vmatmul.mubr.msk.bf16.vlgmr.msra.gmra.mrb[0].mxu0 %vm73_vm1, %v541_v4  ;;  %522 = vmatmul.mubr.msk.bf16.vlgmr.msra.gmra.mrb[0].mxu1 %vm73_vm1, %v542_v6 }
   0x7   :  { %517 = vmatprep.mubr.msk.bf16.mxu0 %vm73_vm1, %v543_v7  ;;  %525 = vmatprep.mubr.msk.bf16.mxu1 %vm73_vm1, %v544_v8 }
   0x9   :  { %232 = vperm.xlu1 %538, %v202_v13   ;;  %222 = vperm.xlu0 %537, %v200_v14  }
   0xe   :  { %518 = vmatmul.mubr.msk.bf16.gmra.mrb[4].mxu0 %vm73_vm1, %v545_v10  ;;  %526 = vmatmul.mubr.msk.bf16.gmra.mrb[4].mxu1 %vm73_vm1, %v546_v12 }
   0xf   :  { %8 = vsyncpa [#allocation3], 0  ;;  %v203_v16 = vld [vmem:[%s690_s0 + $0x20] sm:$0xff]  ;;  %242 = vperm.xlu1 %538, %v204_v15   ;;  %v206_v17 = vld [vmem:[%s690_s0 + $0x38] sm:$0xff] }
  0x10   :  { %237 = vperm.xlu0 %537, %v203_v16   ;;  %v205_v18 = vld [vmem:[%s690_s0 + $0x30] sm:$0xff]  ;;  %v208_v19 = vld [vmem:[%s690_s0 + $0x48] sm:$0xff]  ;;  %v207_v20 = vld [vmem:[%s690_s0 + $0x40] sm:$0xff] }
  0x11   :  { %v210_v21 = vld [vmem:[%s690_s0 + $0x58] sm:$0xff]  ;;  %v209_v22 = vld [vmem:[%s690_s0 + $0x50] sm:$0xff]  ;;  %v212_v23 = vld [vmem:[%s690_s0 + $0x68] sm:$0xff] }
  0x12   :  { %v211_v24 = vld [vmem:[%s690_s0 + $0x60] sm:$0xff]  ;;  %v214_v25 = vld [vmem:[%s690_s0 + $0x78] sm:$0xff]  ;;  %v213_v26 = vld [vmem:[%s690_s0 + $0x70] sm:$0xff]  ;;  %s572_s0 = smov [#allocation2]  }
  0x13   :  { %252 = vperm.xlu1 %538, %v206_v17   ;;  %s396_s5 = sshll.u32 %s572_s0, 4  ;;  %s397_s5 = int_to_ptr.vmem [resolvable:$true] %s396_s5 }
  0x14   :  { %247 = vperm.xlu0 %537, %v205_v18   ;;  %s547_s6 = scalar_lea.vmem %s397_s5, 1024  ;;  %p552_p1 = scmp.lt.s32.totalorder %s397_s5, %s397_s5 }
  0x15   :  { %p548_p0 = scmp.ne.s32.totalorder %s397_s5, %s547_s6  ;;  %p553_p2 = scmp.lt.s32.totalorder %s547_s6, %s547_s6 }
  0x17   :  { %262 = vperm.xlu1 %538, %v208_v19   ;;  %p554_p3 = por %p553_p2, %p552_p1 }
  0x18   :  { %257 = vperm.xlu0 %537, %v207_v20  }
  0x19   :  { %p555_p4 = pnand %p554_p3, %p548_p0 }
  0x1b   :  { %272 = vperm.xlu1 %538, %v210_v21  }
  0x1c   :  { %267 = vperm.xlu0 %537, %v209_v22  }
  0x1f   :  { %282 = vperm.xlu1 %538, %v212_v23  }
  0x20   :  { %277 = vperm.xlu0 %537, %v211_v24  }
  0x23   :  { %292 = vperm.xlu1 %538, %v214_v25  }
  0x24   :  { %287 = vperm.xlu0 %537, %v213_v26  }
  0x84   :  { %v228_v27 = vpop.permute.xlu1 %227  ;;  %v218_v28 = vpop.permute.xlu0 %217 }
  0x88   :  { %v233_v29 = vpop.permute.xlu1 %232  ;;  %v223_v30 = vpop.permute.xlu0 %222 }
  0x8e   :  { %v243_v31 = vpop.permute.xlu1 %242 }
  0x8f   :  { %v238_v32 = vpop.permute.xlu0 %237 }
  0x92   :  { %v253_v33 = vpop.permute.xlu1 %252 }
  0x93   :  { %v248_v34 = vpop.permute.xlu0 %247 }
  0x96   :  { %v263_v35 = vpop.permute.xlu1 %262 }
  0x97   :  { %v258_v36 = vpop.permute.xlu0 %257 }
  0x9a   :  { %v273_v37 = vpop.permute.xlu1 %272 }
  0x9b   :  { %v268_v38 = vpop.permute.xlu0 %267 }
  0x9e   :  { %v283_v39 = vpop.permute.xlu1 %282 }
  0x9f   :  { %v278_v40 = vpop.permute.xlu0 %277 }
  0xa2   :  { %v293_v60 = vpop.permute.xlu1 %292 }
  0xa3   :  { %v288_v62 = vpop.permute.xlu0 %287 }
  0xd9   :  { %v515_v41 = vpop.f32.mrb[0].mxu0  ;;  %v523_v42 = vpop.f32.mrb[0].mxu1 }
  0xda   :  { %v136_v43 = vpop.f32.mrb[1].mxu0  ;;  %v168_v44 = vpop.f32.mrb[1].mxu1  ;;  %v297_v46 = vmul.f32 %v515_v41, %v228_v27  ;;  %v305_v50 = vmul.f32 %v523_v42, %v268_v38 }
  0xdb   :  { %v516_v45 = vpop.f32.mrb[2].mxu0  ;;  %v524_v48 = vpop.f32.mrb[2].mxu1  ;;  %v295_v51 = vmul.f32 %v218_v28, %v136_v43  ;;  %v303_v55 = vmul.f32 %v258_v36, %v168_v44 }
  0xdc   :  { %v298_v47 = vmul.f32 %v516_v45, %v233_v29  ;;  %v139_v49 = vpop.f32.mrb[3].mxu0  ;;  %v306_v52 = vmul.f32 %v524_v48, %v273_v37  ;;  %v171_v54 = vpop.f32.mrb[3].mxu1 }
  0xdd   :  { %v296_v53 = vmul.f32 %v223_v30, %v139_v49  ;;  %v304_v57 = vmul.f32 %v263_v35, %v171_v54 }
  0xde   :  { %v463_v56 = vpack.c.bf16 %v298_v47, %v297_v46  ;;  %v483_v58 = vpack.c.bf16 %v306_v52, %v305_v50 }
  0xdf   :  { %v458_v59 = vpack.c.bf16 %v296_v53, %v295_v51  ;;  %v478_v61 = vpack.c.bf16 %v304_v57, %v303_v55 }
  0xe0   :  { %495 = vst [vmem:[#allocation2 + $0x8] sm:$0xff] %v463_v56   ;;  %499 = vst [vmem:[#allocation2 + $0x28] sm:$0xff] %v483_v58  }
  0xe1   :  { %459 = vst [vmem:[#allocation2] sm:$0xff] %v458_v59   ;;  %v519_v63 = vpop.f32.mrb[4].mxu0  ;;  %498 = vst [vmem:[#allocation2 + $0x20] sm:$0xff] %v478_v61   ;;  %v527_v0 = vpop.f32.mrb[4].mxu1 }
  0xe2   :  { %v152_v1 = vpop.f32.mrb[5].mxu0  ;;  %v184_v2 = vpop.f32.mrb[5].mxu1  ;;  %v301_v4 = vmul.f32 %v519_v63, %v248_v34  ;;  %v309_v8 = vmul.f32 %v527_v0, %v288_v62 }
  0xe3   :  { %v520_v3 = vpop.f32.mrb[6].mxu0  ;;  %v528_v6 = vpop.f32.mrb[6].mxu1  ;;  %v299_v9 = vmul.f32 %v238_v32, %v152_v1  ;;  %v307_v13 = vmul.f32 %v278_v40, %v184_v2 }
  0xe4   :  { %v302_v5 = vmul.f32 %v520_v3, %v253_v33  ;;  %v155_v7 = vpop.f32.mrb[7].mxu0  ;;  %v310_v10 = vmul.f32 %v528_v6, %v293_v60  ;;  %v187_v12 = vpop.f32.mrb[7].mxu1 }
  0xe5   :  { %v300_v11 = vmul.f32 %v243_v31, %v155_v7  ;;  %v308_v15 = vmul.f32 %v283_v39, %v187_v12 }
  0xe6   :  { %v473_v14 = vpack.c.bf16 %v302_v5, %v301_v4  ;;  %v493_v16 = vpack.c.bf16 %v310_v10, %v309_v8 }
  0xe7   :  { %v468_v17 = vpack.c.bf16 %v300_v11, %v299_v9  ;;  %v488_v18 = vpack.c.bf16 %v308_v15, %v307_v13 }
  0xe8   :  { %497 = vst [vmem:[#allocation2 + $0x18] sm:$0xff] %v473_v14   ;;  %501 = vst [vmem:[#allocation2 + $0x38] sm:$0xff] %v493_v16  }
  0xe9   :  { %496 = vst [vmem:[#allocation2 + $0x10] sm:$0xff] %v468_v17   ;;  %500 = vst [vmem:[#allocation2 + $0x30] sm:$0xff] %v488_v18  }
  0xea   :  { %558 = shalt.err (!%p555_p4)
}
  0xeb   :  { %s559_s9 = scalar_lea.hbm %s693_s3, 1024 }
  0xec   :  { %p560_p5 = scmp.ne.s32.totalorder %s693_s3, %s559_s9  ;;  %p563_p6 = scmp.lt.u32.totalorder %s559_s9, %s693_s3 }
  0xee   :  { %p565_p7 = pnand %p563_p6, %p560_p5 }
  0xf0   :  { %568 = shalt.err (!%p565_p7)
}
  0xf1   :  { %s573_s13 = smov 64   ;;  %s574_s14 = smov 4  }
  0xf2   :  { %402 = dma.vmem_to_hbm [thread:$0]  %s397_s5, 1024, %s693_s3, [#allocation3], %s573_s13, %s573_s13, %s574_s14  }
  0xf3   :  { %569 = dma.done.wait [#allocation3], 1024  }
  0xf4   :  { %570 = vsyncadd [#allocation3], 4294966272 }
  0xf5   :  { %406 = vsyncpa [#allocation3], 1 }

</bundles_post_ra>
